<compile_context>
chip_gen: v7x
topology: tpu7x:2x2x1
jax: 0.10.0
libtpu: 0.0.40
codegen_flags: <defaults>
</compile_context>

<pallas_src>
import functools

import jax
import jax.numpy as jnp
from jax.experimental import pallas as pl
from jax.experimental.pallas import tpu as pltpu


def _round_up(x, m):
    return ((x + m - 1) // m) * m


def bahdanau_kernel(q_ref, keys_ref, wq_ref, wk_ref, v_ref,
                    ctx_ref, attn_ref,
                    pq_sc, m_sc, l_sc, acc_sc,
                    *, seq_len):
    s = pl.program_id(1)
    tb, ts, hp = keys_ref.shape
    ap = wk_ref.shape[1]

    @pl.when(s == 0)
    def _init():
        # Query projection once per batch tile; resident across the S loop.
        pq_sc[...] = jnp.dot(q_ref[...], wq_ref[...],
                             preferred_element_type=jnp.float32)
        m_sc[...] = jnp.full_like(m_sc, -jnp.inf)
        l_sc[...] = jnp.zeros_like(l_sc)
        acc_sc[...] = jnp.zeros_like(acc_sc)

    keys = keys_ref[...]                                        # (tb, ts, Hp) bf16

    # Additive energies for this sequence tile (bf16 MXU, f32 accumulation).
    proj_k = jnp.dot(keys.reshape(tb * ts, hp), wk_ref[...],
                     preferred_element_type=jnp.float32)        # (tb*ts, Ap)
    energy = jnp.tanh(proj_k.reshape(tb, ts, ap) + pq_sc[...][:, None, :])
    # TODO(synk): on v6e/v7x the pre-tanh sum could be cast to bf16 (bf16 EUP
    # path); kept f32 so the same kernel is also correct/fast-enough on v5e.

    # score = energy . v  (VPU broadcast-multiply + lane reduce; MXU has slack)
    scores = jnp.sum(energy * v_ref[...][None, :, :], axis=-1)  # (tb, ts) f32

    # Mask padded sequence positions.
    pos = s * ts + jax.lax.broadcasted_iota(jnp.int32, (tb, ts), 1)
    scores = jnp.where(pos < seq_len, scores, jnp.float32(-1e30))

    # Stage raw masked scores into the resident attention-output slab; they are
    # re-normalized once on the last S step (global max/denominator known then).
    if attn_ref.shape[1] == ts:            # single S tile: static full store
        attn_ref[...] = scores
    else:                                  # multi-tile: ts is a multiple of 128
        attn_ref[:, pl.ds(pl.multiple_of(s * ts, ts), ts)] = scores

    # Online (flash-style) softmax update.
    m_prev = m_sc[...]
    m_new = jnp.maximum(m_prev, jnp.max(scores, axis=-1, keepdims=True))
    alpha = jnp.exp(m_prev - m_new)                             # (tb, 1)
    e = jnp.exp(scores - m_new)                                 # (tb, ts)
    l_sc[...] = alpha * l_sc[...] + jnp.sum(e, axis=-1, keepdims=True)

    # Context accumulation: bf16 batched matmul on the MXU, f32 accumulation
    # (no f32 copy of the keys block).
    ctx_part = jnp.einsum("bqs,bsh->bqh",
                          e.astype(jnp.bfloat16)[:, None, :], keys,
                          preferred_element_type=jnp.float32)[:, 0, :]  # (tb, Hp)
    acc_sc[...] = alpha * acc_sc[...] + ctx_part
    m_sc[...] = m_new

    @pl.when(s == pl.num_programs(1) - 1)
    def _finalize():
        inv_l = 1.0 / l_sc[...]                                 # exact normalization
        ctx_ref[...] = (acc_sc[...] * inv_l).astype(ctx_ref.dtype)
        raw = attn_ref[...]                                     # (tb, Sp) raw scores
        attn_ref[...] = (jnp.exp(raw - m_sc[...]) * inv_l).astype(attn_ref.dtype)


def _pad_cast(x, shape, dtype):
    """Cast to dtype; zero-pad only when needed (skips the extra HBM copy of
    already-aligned operands; pad + cast fuse under jit otherwise)."""
    x = x.astype(dtype)
    if tuple(x.shape) == tuple(shape):
        return x
    out = jnp.zeros(shape, dtype)
    return out.at[tuple(slice(0, d) for d in x.shape)].set(x)


@jax.jit
def bahdanau_attention(query, keys, w_q, w_k, v):
    B, H = query.shape
    _, S, _ = keys.shape
    A = w_q.shape[1]

    Hp = _round_up(H, 128)
    Ap = _round_up(A, 128)

    # Batch tile: sublane-aligned; keeps >=2 "parallel" batch tiles once
    # B >= 16 so both v7x TensorCores get work.
    tb = 8 if B <= 16 else 16
    Bp = _round_up(B, tb)

    # Sequence tile for the flash-style online softmax.  Sized so that the
    # double-buffered bf16 keys block plus the f32 proj_k/energy temporaries
    # stay well inside v7x's 64 MiB physical VMEM.
    vmem_budget = 40 * 1024 * 1024

    def _est(ts_):
        return 2 * tb * ts_ * Hp * 2 + 2 * tb * ts_ * Ap * 4

    s8 = _round_up(S, 8)
    if s8 <= 512:
        ts = s8                            # single sequence tile
    else:
        ts = 512
        while ts > 128 and _est(ts) > vmem_budget:
            ts //= 2                       # stays a multiple of 128
    Sp = _round_up(S, ts)

    qp = _pad_cast(query, (Bp, Hp), jnp.bfloat16)
    kp = _pad_cast(keys, (Bp, Sp, Hp), jnp.bfloat16)
    wqp = _pad_cast(w_q, (Hp, Ap), jnp.bfloat16)
    wkp = _pad_cast(w_k, (Hp, Ap), jnp.bfloat16)
    vp = _pad_cast(v.reshape(1, A), (1, Ap), jnp.float32)

    kernel = functools.partial(bahdanau_kernel, seq_len=S)

    # TODO(synk): if the keys DMA is still exposed at large S/H, add
    # pipeline_mode=pl.Buffered(3) on the keys BlockSpec.
    ctx_p, attn_p = pl.pallas_call(
        kernel,
        out_shape=(
            jax.ShapeDtypeStruct((Bp, Hp), jnp.float32),
            jax.ShapeDtypeStruct((Bp, Sp), jnp.float32),
        ),
        grid_spec=pltpu.PrefetchScalarGridSpec(
            num_scalar_prefetch=0,
            grid=(Bp // tb, Sp // ts),
            in_specs=[
                pl.BlockSpec((tb, Hp), lambda b, s: (b, 0)),          # query
                pl.BlockSpec((tb, ts, Hp), lambda b, s: (b, s, 0)),   # keys (streamed)
                pl.BlockSpec((Hp, Ap), lambda b, s: (0, 0)),          # W_q (resident)
                pl.BlockSpec((Hp, Ap), lambda b, s: (0, 0)),          # W_k (resident)
                pl.BlockSpec((1, Ap), lambda b, s: (0, 0)),           # v   (resident)
            ],
            out_specs=[
                pl.BlockSpec((tb, Hp), lambda b, s: (b, 0)),          # context
                pl.BlockSpec((tb, Sp), lambda b, s: (b, 0)),          # attention weights
            ],
            scratch_shapes=[
                pltpu.VMEM((tb, Ap), jnp.float32),                    # proj_q
                pltpu.VMEM((tb, 1), jnp.float32),                     # running max
                pltpu.VMEM((tb, 1), jnp.float32),                     # running denom
                pltpu.VMEM((tb, Hp), jnp.float32),                    # context acc
            ],
        ),
        compiler_params=pltpu.CompilerParams(
            dimension_semantics=("parallel", "arbitrary"),
            vmem_limit_bytes=48 * 1024 * 1024,
        ),
    )(qp, kp, wqp, wkp, vp)

    return ctx_p[:B, :H], attn_p[:B, :S]


def bahdanau_reference(query, keys, w_q, w_k, v):
    # Pure-JAX (f32) reference for correctness checking.
    proj_q = query @ w_q                                   # (B, A)
    proj_k = jnp.einsum("bsh,ha->bsa", keys, w_k)          # (B, S, A)
    energy = jnp.tanh(proj_k + proj_q[:, None, :])         # (B, S, A)
    scores = jnp.einsum("bsa,a->bs", energy, v)            # (B, S)
    attn = jax.nn.softmax(scores, axis=-1)                 # (B, S)
    ctx = jnp.einsum("bs,bsh->bh", attn, keys)             # (B, H)
    return ctx, attn


if __name__ == "__main__":
    # Small shapes; S/H/A intentionally not 128-aligned to exercise padding
    # and the sequence-position mask.
    B, S, H, A = 8, 20, 32, 48

    key = jax.random.PRNGKey(0)
    k1, k2, k3, k4, k5 = jax.random.split(key, 5)

    query = jax.random.normal(k1, (B, H), dtype=jnp.float32)      # decoder state
    keys = jax.random.normal(k2, (B, S, H), dtype=jnp.float32)    # encoder states
    # deterministic synthetic parameters (no checkpoint loading)
    w_q = jax.random.normal(k3, (H, A), dtype=jnp.float32) * 0.1
    w_k = jax.random.normal(k4, (H, A), dtype=jnp.float32) * 0.1
    v = jax.random.normal(k5, (A,), dtype=jnp.float32) * 0.1

    ctx, attn = bahdanau_attention(query, keys, w_q, w_k, v)
    jax.block_until_ready((ctx, attn))

    ctx_exp, attn_exp = bahdanau_reference(query, keys, w_q, w_k, v)
    # bf16 MXU inputs (f32 accumulation) -> relaxed tolerance vs f32 reference.
    assert jnp.allclose(attn, attn_exp, atol=2e-2, rtol=2e-2), "attn mismatch"
    assert jnp.allclose(ctx, ctx_exp, atol=2e-2, rtol=2e-2), "context mismatch"

    print("KERNEL_OK")
</pallas_src>

<mosaic_0001>
module attributes {stable_mosaic.version = 11 : i64} {
  func.func @bahdanau_kernel(%arg0: i32, %arg1: i32, %arg2: memref<8x128xbf16, #tpu.memory_space<vmem>>, %arg3: memref<8x24x128xbf16, #tpu.memory_space<vmem>>, %arg4: memref<128x128xbf16, #tpu.memory_space<vmem>>, %arg5: memref<128x128xbf16, #tpu.memory_space<vmem>>, %arg6: memref<1x128xf32, #tpu.memory_space<vmem>>, %arg7: memref<8x128xf32, #tpu.memory_space<vmem>>, %arg8: memref<8x24xf32, #tpu.memory_space<vmem>>, %arg9: memref<8x128xf32, #tpu.memory_space<vmem>>, %arg10: memref<8x1xf32, #tpu.memory_space<vmem>>, %arg11: memref<8x1xf32, #tpu.memory_space<vmem>>, %arg12: memref<8x128xf32, #tpu.memory_space<vmem>>) attributes {dimension_semantics = [#tpu.dimension_semantics<parallel>, #tpu.dimension_semantics<arbitrary>], iteration_bounds = array<i64: 1, 1>, scalar_prefetch = 0 : i64, scratch_operands = 4 : i64, tpu.core_type = #tpu.core_type<tc>, window_params = [{transform_indices = @transform_0, window_bounds = array<i64: 8, 128>}, {transform_indices = @transform_1, window_bounds = array<i64: 8, 24, 128>}, {pipeline_mode = #tpu.pipeline_mode<synchronous>, transform_indices = @transform_2, window_bounds = array<i64: 128, 128>}, {pipeline_mode = #tpu.pipeline_mode<synchronous>, transform_indices = @transform_3, window_bounds = array<i64: 128, 128>}, {pipeline_mode = #tpu.pipeline_mode<synchronous>, transform_indices = @transform_4, window_bounds = array<i64: 1, 128>}, {transform_indices = @transform_5, window_bounds = array<i64: 8, 128>}, {transform_indices = @transform_6, window_bounds = array<i64: 8, 24>}]} {
    %c0_i32 = arith.constant 0 : i32
    %0 = arith.cmpi eq, %arg1, %c0_i32 : i32
    %1 = arith.extui %0 : i1 to i32
    %c0_i32_0 = arith.constant 0 : i32
    %2 = arith.cmpi ne, %1, %c0_i32_0 : i32
    scf.if %2 {
      %c0_30 = arith.constant 0 : index
      %c0_31 = arith.constant 0 : index
      %55 = vector.load %arg2[%c0_30, %c0_31] : memref<8x128xbf16, #tpu.memory_space<vmem>>, vector<8x128xbf16>
      %c0_32 = arith.constant 0 : index
      %c0_33 = arith.constant 0 : index
      %56 = vector.load %arg4[%c0_32, %c0_33] : memref<128x128xbf16, #tpu.memory_space<vmem>>, vector<128x128xbf16>
      %cst_34 = arith.constant dense<0.000000e+00> : vector<8x128xf32>
      %57 = tpu.matmul %55, %56, %cst_34 {dimension_numbers = #tpu.dot_dimension_numbers<[1], [0], [0], [1], [0, 0, 1, 1], [], []>} : vector<8x128xbf16>, vector<128x128xbf16>, vector<8x128xf32> -> vector<8x128xf32>
      %c0_35 = arith.constant 0 : index
      %c0_36 = arith.constant 0 : index
      %58 = vector.load %arg9[%c0_35, %c0_36] : memref<8x128xf32, #tpu.memory_space<vmem>>, vector<8x128xf32>
      tpu.vector_store %arg9[%c0_35, %c0_36], %57 {strides = array<i32>} : memref<8x128xf32, #tpu.memory_space<vmem>>, vector<8x128xf32>,
      %cst_37 = arith.constant 0xFF800000 : f32
      %59 = vector.broadcast %cst_37 : f32 to vector<8x1xf32>
      %c0_38 = arith.constant 0 : index
      %c0_39 = arith.constant 0 : index
      %60 = vector.load %arg10[%c0_38, %c0_39] : memref<8x1xf32, #tpu.memory_space<vmem>>, vector<8x1xf32>
      tpu.vector_store %arg10[%c0_38, %c0_39], %59 {strides = array<i32>} : memref<8x1xf32, #tpu.memory_space<vmem>>, vector<8x1xf32>,
      %cst_40 = arith.constant 0.000000e+00 : f32
      %61 = vector.broadcast %cst_40 : f32 to vector<8x1xf32>
      %c0_41 = arith.constant 0 : index
      %c0_42 = arith.constant 0 : index
      %62 = vector.load %arg11[%c0_41, %c0_42] : memref<8x1xf32, #tpu.memory_space<vmem>>, vector<8x1xf32>
      tpu.vector_store %arg11[%c0_41, %c0_42], %61 {strides = array<i32>} : memref<8x1xf32, #tpu.memory_space<vmem>>, vector<8x1xf32>,
      %cst_43 = arith.constant 0.000000e+00 : f32
      %63 = vector.broadcast %cst_43 : f32 to vector<8x128xf32>
      %c0_44 = arith.constant 0 : index
      %c0_45 = arith.constant 0 : index
      %64 = vector.load %arg12[%c0_44, %c0_45] : memref<8x128xf32, #tpu.memory_space<vmem>>, vector<8x128xf32>
      tpu.vector_store %arg12[%c0_44, %c0_45], %63 {strides = array<i32>} : memref<8x128xf32, #tpu.memory_space<vmem>>, vector<8x128xf32>,
    } else {
    }
    %c0 = arith.constant 0 : index
    %c0_1 = arith.constant 0 : index
    %c0_2 = arith.constant 0 : index
    %3 = vector.load %arg3[%c0, %c0_1, %c0_2] : memref<8x24x128xbf16, #tpu.memory_space<vmem>>, vector<8x24x128xbf16>
    %4 = vector.shape_cast %3 : vector<8x24x128xbf16> to vector<192x128xbf16>
    %c0_3 = arith.constant 0 : index
    %c0_4 = arith.constant 0 : index
    %5 = vector.load %arg5[%c0_3, %c0_4] : memref<128x128xbf16, #tpu.memory_space<vmem>>, vector<128x128xbf16>
    %cst = arith.constant dense<0.000000e+00> : vector<192x128xf32>
    %6 = tpu.matmul %4, %5, %cst {dimension_numbers = #tpu.dot_dimension_numbers<[1], [0], [0], [1], [0, 0, 1, 1], [], []>} : vector<192x128xbf16>, vector<128x128xbf16>, vector<192x128xf32> -> vector<192x128xf32>
    %7 = vector.shape_cast %6 : vector<192x128xf32> to vector<8x24x128xf32>
    %c0_5 = arith.constant 0 : index
    %c0_6 = arith.constant 0 : index
    %8 = vector.load %arg9[%c0_5, %c0_6] : memref<8x128xf32, #tpu.memory_space<vmem>>, vector<8x128xf32>
    %9 = vector.shape_cast %8 : vector<8x128xf32> to vector<8x1x128xf32>
    %10 = vector.broadcast %9 : vector<8x1x128xf32> to vector<8x24x128xf32>
    %11 = arith.addf %7, %10 : vector<8x24x128xf32>
    %12 = math.tanh %11 : vector<8x24x128xf32>
    %c0_7 = arith.constant 0 : index
    %c0_8 = arith.constant 0 : index
    %13 = vector.load %arg6[%c0_7, %c0_8] : memref<1x128xf32, #tpu.memory_space<vmem>>, vector<1x128xf32>
    %14 = vector.shape_cast %13 : vector<1x128xf32> to vector<1x1x128xf32>
    %15 = vector.broadcast %14 : vector<1x1x128xf32> to vector<8x24x128xf32>
    %16 = arith.mulf %12, %15 : vector<8x24x128xf32>
    %cst_9 = arith.constant dense<0.000000e+00> : vector<8x24xf32>
    %17 = vector.multi_reduction <add>, %16, %cst_9 [2] : vector<8x24x128xf32> to vector<8x24xf32>
    %c24_i32 = arith.constant 24 : i32
    %18 = arith.muli %arg1, %c24_i32 : i32
    %19 = tpu.iota {dimensions = array<i32: 1>} : vector<8x24xi32>
    %20 = vector.broadcast %18 : i32 to vector<8x24xi32>
    %21 = arith.addi %20, %19 : vector<8x24xi32>
    %c20_i32 = arith.constant 20 : i32
    %22 = vector.broadcast %c20_i32 : i32 to vector<8x24xi32>
    %23 = arith.cmpi slt, %21, %22 : vector<8x24xi32>
    %cst_10 = arith.constant -1.000000e+30 : f32
    %24 = vector.broadcast %cst_10 : f32 to vector<8x24xf32>
    %25 = arith.select %23, %17, %24 : vector<8x24xi1>, vector<8x24xf32>
    %c0_11 = arith.constant 0 : index
    %c0_12 = arith.constant 0 : index
    %26 = vector.load %arg8[%c0_11, %c0_12] : memref<8x24xf32, #tpu.memory_space<vmem>>, vector<8x24xf32>
    tpu.vector_store %arg8[%c0_11, %c0_12], %25 {strides = array<i32>} : memref<8x24xf32, #tpu.memory_space<vmem>>, vector<8x24xf32>,
    %c0_13 = arith.constant 0 : index
    %c0_14 = arith.constant 0 : index
    %27 = vector.load %arg10[%c0_13, %c0_14] : memref<8x1xf32, #tpu.memory_space<vmem>>, vector<8x1xf32>
    %cst_15 = arith.constant dense<0xFF800000> : vector<8xf32>
    %28 = vector.multi_reduction <maximumf>, %25, %cst_15 [1] : vector<8x24xf32> to vector<8xf32>
    %29 = vector.shape_cast %28 : vector<8xf32> to vector<8x1xf32>
    %30 = arith.maximumf %27, %29 : vector<8x1xf32>
    %31 = arith.subf %27, %30 : vector<8x1xf32>
    %32 = math.exp %31 : vector<8x1xf32>
    %33 = vector.broadcast %30 : vector<8x1xf32> to vector<8x24xf32>
    %34 = arith.subf %25, %33 : vector<8x24xf32>
    %35 = math.exp %34 : vector<8x24xf32>
    %c0_16 = arith.constant 0 : index
    %c0_17 = arith.constant 0 : index
    %36 = vector.load %arg11[%c0_16, %c0_17] : memref<8x1xf32, #tpu.memory_space<vmem>>, vector<8x1xf32>
    %37 = arith.mulf %32, %36 : vector<8x1xf32>
    %cst_18 = arith.constant dense<0.000000e+00> : vector<8xf32>
    %38 = vector.multi_reduction <add>, %35, %cst_18 [1] : vector<8x24xf32> to vector<8xf32>
    %39 = vector.shape_cast %38 : vector<8xf32> to vector<8x1xf32>
    %40 = arith.addf %37, %39 : vector<8x1xf32>
    %c0_19 = arith.constant 0 : index
    %c0_20 = arith.constant 0 : index
    %41 = vector.load %arg11[%c0_19, %c0_20] : memref<8x1xf32, #tpu.memory_space<vmem>>, vector<8x1xf32>
    tpu.vector_store %arg11[%c0_19, %c0_20], %40 {strides = array<i32>} : memref<8x1xf32, #tpu.memory_space<vmem>>, vector<8x1xf32>,
    %42 = arith.truncf %35 : vector<8x24xf32> to vector<8x24xbf16>
    %43 = vector.shape_cast %42 : vector<8x24xbf16> to vector<8x1x24xbf16>
    "tpu.trace_start"() <{level = 10 : i32, message = "bqs,bsh->bqh"}> : () -> ()
    %cst_21 = arith.constant dense<0.000000e+00> : vector<8x1x128xf32>
    %44 = tpu.matmul %43, %3, %cst_21 {dimension_numbers = #tpu.dot_dimension_numbers<[2], [1], [1], [2], [0, 0, 0, 1, 1, 2], [0], [0]>} : vector<8x1x24xbf16>, vector<8x24x128xbf16>, vector<8x1x128xf32> -> vector<8x1x128xf32>
    "tpu.trace_stop"() : () -> ()
    %45 = vector.shape_cast %44 : vector<8x1x128xf32> to vector<8x128xf32>
    %c0_22 = arith.constant 0 : index
    %c0_23 = arith.constant 0 : index
    %46 = vector.load %arg12[%c0_22, %c0_23] : memref<8x128xf32, #tpu.memory_space<vmem>>, vector<8x128xf32>
    %47 = vector.broadcast %32 : vector<8x1xf32> to vector<8x128xf32>
    %48 = arith.mulf %47, %46 : vector<8x128xf32>
    %49 = arith.addf %48, %45 : vector<8x128xf32>
    %c0_24 = arith.constant 0 : index
    %c0_25 = arith.constant 0 : index
    %50 = vector.load %arg12[%c0_24, %c0_25] : memref<8x128xf32, #tpu.memory_space<vmem>>, vector<8x128xf32>
    tpu.vector_store %arg12[%c0_24, %c0_25], %49 {strides = array<i32>} : memref<8x128xf32, #tpu.memory_space<vmem>>, vector<8x128xf32>,
    %c0_26 = arith.constant 0 : index
    %c0_27 = arith.constant 0 : index
    %51 = vector.load %arg10[%c0_26, %c0_27] : memref<8x1xf32, #tpu.memory_space<vmem>>, vector<8x1xf32>
    tpu.vector_store %arg10[%c0_26, %c0_27], %30 {strides = array<i32>} : memref<8x1xf32, #tpu.memory_space<vmem>>, vector<8x1xf32>,
    %c0_i32_28 = arith.constant 0 : i32
    %52 = arith.cmpi eq, %arg1, %c0_i32_28 : i32
    %53 = arith.extui %52 : i1 to i32
    %c0_i32_29 = arith.constant 0 : i32
    %54 = arith.cmpi ne, %53, %c0_i32_29 : i32
    scf.if %54 {
      %c0_30 = arith.constant 0 : index
      %c0_31 = arith.constant 0 : index
      %55 = vector.load %arg11[%c0_30, %c0_31] : memref<8x1xf32, #tpu.memory_space<vmem>>, vector<8x1xf32>
      %cst_32 = arith.constant 1.000000e+00 : f32
      %56 = vector.broadcast %cst_32 : f32 to vector<8x1xf32>
      %57 = arith.divf %56, %55 : vector<8x1xf32>
      %c0_33 = arith.constant 0 : index
      %c0_34 = arith.constant 0 : index
      %58 = vector.load %arg12[%c0_33, %c0_34] : memref<8x128xf32, #tpu.memory_space<vmem>>, vector<8x128xf32>
      %59 = vector.broadcast %57 : vector<8x1xf32> to vector<8x128xf32>
      %60 = arith.mulf %58, %59 : vector<8x128xf32>
      %c0_35 = arith.constant 0 : index
      %c0_36 = arith.constant 0 : index
      %61 = vector.load %arg7[%c0_35, %c0_36] : memref<8x128xf32, #tpu.memory_space<vmem>>, vector<8x128xf32>
      tpu.vector_store %arg7[%c0_35, %c0_36], %60 {strides = array<i32>} : memref<8x128xf32, #tpu.memory_space<vmem>>, vector<8x128xf32>,
      %c0_37 = arith.constant 0 : index
      %c0_38 = arith.constant 0 : index
      %62 = vector.load %arg8[%c0_37, %c0_38] : memref<8x24xf32, #tpu.memory_space<vmem>>, vector<8x24xf32>
      %c0_39 = arith.constant 0 : index
      %c0_40 = arith.constant 0 : index
      %63 = vector.load %arg10[%c0_39, %c0_40] : memref<8x1xf32, #tpu.memory_space<vmem>>, vector<8x1xf32>
      %64 = vector.broadcast %63 : vector<8x1xf32> to vector<8x24xf32>
      %65 = arith.subf %62, %64 : vector<8x24xf32>
      %66 = math.exp %65 : vector<8x24xf32>
      %67 = vector.broadcast %57 : vector<8x1xf32> to vector<8x24xf32>
      %68 = arith.mulf %66, %67 : vector<8x24xf32>
      %c0_41 = arith.constant 0 : index
      %c0_42 = arith.constant 0 : index
      %69 = vector.load %arg8[%c0_41, %c0_42] : memref<8x24xf32, #tpu.memory_space<vmem>>, vector<8x24xf32>
      tpu.vector_store %arg8[%c0_41, %c0_42], %68 {strides = array<i32>} : memref<8x24xf32, #tpu.memory_space<vmem>>, vector<8x24xf32>,
    } else {
    }
    return
  }
  func.func @transform_0(%arg0: i32, %arg1: i32) -> (i32, i32) {
    %c0_i32 = arith.constant 0 : i32
    %c0_i32_0 = arith.constant 0 : i32
    return %arg0, %c0_i32 : i32, i32
  }
  func.func @transform_1(%arg0: i32, %arg1: i32) -> (i32, i32, i32) {
    %c0_i32 = arith.constant 0 : i32
    %c0_i32_0 = arith.constant 0 : i32
    return %arg0, %arg1, %c0_i32 : i32, i32, i32
  }
  func.func @transform_2(%arg0: i32, %arg1: i32) -> (i32, i32) {
    %c0_i32 = arith.constant 0 : i32
    %c0_i32_0 = arith.constant 0 : i32
    %c0_i32_1 = arith.constant 0 : i32
    return %c0_i32, %c0_i32_0 : i32, i32
  }
  func.func @transform_3(%arg0: i32, %arg1: i32) -> (i32, i32) {
    %c0_i32 = arith.constant 0 : i32
    %c0_i32_0 = arith.constant 0 : i32
    %c0_i32_1 = arith.constant 0 : i32
    return %c0_i32, %c0_i32_0 : i32, i32
  }
  func.func @transform_4(%arg0: i32, %arg1: i32) -> (i32, i32) {
    %c0_i32 = arith.constant 0 : i32
    %c0_i32_0 = arith.constant 0 : i32
    %c0_i32_1 = arith.constant 0 : i32
    return %c0_i32, %c0_i32_0 : i32, i32
  }
  func.func @transform_5(%arg0: i32, %arg1: i32) -> (i32, i32) {
    %c0_i32 = arith.constant 0 : i32
    %c0_i32_0 = arith.constant 0 : i32
    return %arg0, %c0_i32 : i32, i32
  }
  func.func @transform_6(%arg0: i32, %arg1: i32) -> (i32, i32) {
    %c0_i32 = arith.constant 0 : i32
    %c0_i32_0 = arith.constant 0 : i32
    return %arg0, %c0_i32 : i32, i32
  }
}

</mosaic_0001>

<bundles_post_ra>
// kernel: bahdanau_attention.1
= control target key start
LH: loop header
LB: loop body
LE: loop exit
PB: predicated region body
PF: predicated region fallthrough
CT: control target
= control target key end

     0   :  { %12 = vsyncpa [#allocation7], 0  ;;  %v1755_v1 = vmov 0.0   ;;  %vm1756_vm0 = vmmov 0   ;;  %s2233_s0 = inlined_call_operand.vmem [shape: bf16[8,128], index: 0, kind: input, shape index: {}]   ;;  %s2234_s1 = inlined_call_operand.vmem [shape: bf16[8,24,128], index: 1, kind: input, shape index: {}]   ;;  %s2235_s2 = inlined_call_operand.vmem [shape: bf16[128,128], index: 2, kind: input, shape index: {}]   ;;  %s2236_s3 = inlined_call_operand.vmem [shape: bf16[128,128], index: 3, kind: input, shape index: {}]   ;;  %s2237_s4 = inlined_call_operand.vmem [shape: f32[1,128], index: 4, kind: input, shape index: {}]   ;;  %s2238_s5 = inlined_call_operand.hbm [shape: f32[8,128], index: 5, kind: output, shape index: {0}]   ;;  %s2239_s6 = inlined_call_operand.hbm [shape: f32[8,24], index: 6, kind: output, shape index: {1}]  }
   0x1   :  { %v1619_v0 = vld [vmem:[%s2235_s2] sm:$0xff]   ;;  %1486 = vmatprep.subr.bf16.mxu0 %v1755_v1  ;;  %v1621_v3 = vld [vmem:[%s2235_s2 + $0x8] sm:$0xff]   ;;  %1502 = vmatprep.mubr.msk.bf16.mxu0 %vm1756_vm0, %v1755_v1  ;;  %v1624_v5 = vld [vmem:[%s2236_s3 + $0x10] sm:$0xff]  }
   0x2   :  { %v1620_v2 = vld [vmem:[%s2236_s3] sm:$0xff]   ;;  %1487 = vmatpush3.bf16.msra.mxu0 %v1619_v0  ;;  %v1622_v4 = vld [vmem:[%s2236_s3 + $0x8] sm:$0xff]   ;;  %v1623_v6 = vld [vmem:[%s2235_s2 + $0x10] sm:$0xff]  }
   0x3   :  { %1506 = vmatprep.subr.bf16.mxu1 %v1620_v2  ;;  %1488 = vmatprep.subr.bf16.mxu0 %v1755_v1  ;;  %v1626_v7 = vld [vmem:[%s2236_s3 + $0x18] sm:$0xff]   ;;  %v1628_v9 = vld [vmem:[%s2236_s3 + $0x20] sm:$0xff]   ;;  %v1629_v11 = vld [vmem:[%s2235_s2 + $0x28] sm:$0xff]  }
   0x4   :  { %1507 = vmatpush3.bf16.msra.mxu1 %v1620_v2  ;;  %v1625_v8 = vld [vmem:[%s2235_s2 + $0x18] sm:$0xff]   ;;  %v1627_v10 = vld [vmem:[%s2235_s2 + $0x20] sm:$0xff]   ;;  %v1630_v12 = vld [vmem:[%s2236_s3 + $0x28] sm:$0xff]  }
   0x5   :  { %1508 = vmatprep.subr.bf16.mxu1 %v1622_v4  ;;  %v1635_v13 = vld [vmem:[%s2234_s1] sm:$0xff]   ;;  %v1846_v14 = vld [vmem:[%s2234_s1 + $0xc] sm:$0xf]  ;;  %v1851_v15 = vld [vmem:[%s2234_s1 + $0x10] sm:$0xf] }
   0x6   :  { %1489 = vmatpush3.bf16.msra.mxu0 %v1621_v3  ;;  %1522 = vmatprep.mubr.bf16.mxu1 %v1635_v13  ;;  %v1412_v16 = vcombine.low %v1846_v14, %v1851_v15  ;;  %v1859_v17 = vld [vmem:[%s2234_s1 + $0x24] sm:$0xf]  ;;  %v1864_v18 = vld [vmem:[%s2234_s1 + $0x28] sm:$0xf]  ;;  %v1632_v19 = vld [vmem:[%s2236_s3 + $0x30] sm:$0xff]  }
   0x7   :  { %1490 = vmatprep.subr.bf16.mxu0 %v1755_v1  ;;  %v1418_v20 = vcombine.low %v1859_v17, %v1864_v18  ;;  %v1631_v21 = vld [vmem:[%s2235_s2 + $0x30] sm:$0xff]   ;;  %v1877_v22 = vld [vmem:[%s2234_s1 + $0x3c] sm:$0xf]  ;;  %v1882_v23 = vld [vmem:[%s2234_s1 + $0x40] sm:$0xf] }
   0x8   :  { %1509 = vmatpush3.bf16.msra.mxu1 %v1622_v4  ;;  %v1424_v24 = vcombine.low %v1877_v22, %v1882_v23  ;;  %v1634_v25 = vld [vmem:[%s2236_s3 + $0x38] sm:$0xff]   ;;  %v1893_v26 = vld [vmem:[%s2234_s1 + $0x54] sm:$0xf] }
   0x9   :  { %1510 = vmatprep.subr.bf16.mxu1 %v1624_v5  ;;  %v1898_v27 = vld [vmem:[%s2234_s1 + $0x58] sm:$0xf] }
   0xa   :  { %1491 = vmatpush3.bf16.msra.mxu0 %v1623_v6 }
   0xb   :  { %1492 = vmatprep.subr.bf16.mxu0 %v1755_v1 }
   0xc   :  { %1511 = vmatpush3.bf16.msra.mxu1 %v1624_v5 }
   0xd   :  { %1512 = vmatprep.subr.bf16.mxu1 %v1626_v7 }
   0xe   :  { %1493 = vmatpush3.bf16.msra.mxu0 %v1625_v8 }
   0xf   :  { %1494 = vmatprep.subr.bf16.mxu0 %v1755_v1 }
  0x10   :  { %1513 = vmatpush3.bf16.msra.mxu1 %v1626_v7 }
  0x11   :  { %1514 = vmatprep.subr.bf16.mxu1 %v1628_v9 }
  0x12   :  { %1495 = vmatpush3.bf16.msra.mxu0 %v1627_v10 }
  0x13   :  { %1496 = vmatprep.subr.bf16.mxu0 %v1755_v1 }
  0x14   :  { %1515 = vmatpush3.bf16.msra.mxu1 %v1628_v9 }
  0x15   :  { %1516 = vmatprep.subr.bf16.mxu1 %v1630_v12 }
  0x16   :  { %1497 = vmatpush3.bf16.msra.mxu0 %v1629_v11 }
  0x17   :  { %1498 = vmatprep.subr.bf16.mxu0 %v1755_v1 }
  0x18   :  { %1517 = vmatpush3.bf16.msra.mxu1 %v1630_v12 }
  0x19   :  { %1518 = vmatprep.subr.bf16.mxu1 %v1632_v19 }
  0x1a   :  { %13 = vsyncpa [#allocation9], 0  ;;  %1499 = vmatpush3.bf16.msra.mxu0 %v1631_v21  ;;  %v1633_v28 = vld [vmem:[%s2235_s2 + $0x38] sm:$0xff]   ;;  %v1430_v29 = vcombine.low %v1893_v26, %v1898_v27  ;;  %v1909_v30 = vld [vmem:[%s2234_s1 + $0x8] sm:$0xf]  ;;  %v434_v52 = vlaneseq  ;;  %vm135_vm1 = vcmask 7168  }
  0x1b   :  { %1500 = vmatprep.subr.bf16.mxu0 %v1755_v1  ;;  %v1914_v31 = vld [vmem:[%s2234_s1 + $0x14] sm:$0xf]  ;;  %v29_v32 = vld [vmem:[%s2233_s0] sm:$0xf]  ;;  %v1389_v33 = vcombine.low %v1909_v30, %v1846_v14  ;;  %v1647_v35 = vld [vmem:[%s2234_s1 + $0x48] sm:$0xff]   ;;  %137 = vst.msk [vmem:[#allocation4] sm:$0xff] %vm135_vm1, %v1755_v1 }
  0x1c   :  { %1519 = vmatpush3.bf16.msra.mxu1 %v1632_v19  ;;  %v1390_v34 = vcombine.low %v1851_v15, %v1914_v31  ;;  %v1934_v36 = vld [vmem:[%s2234_s1 + $0x20] sm:$0xf]  ;;  %v1940_v37 = vld [vmem:[%s2234_s1 + $0x18] sm:$0xff]   ;;  %v1948_v39 = vld [vmem:[%s2234_s1 + $0x2c] sm:$0xf]  ;;  %v1989_v54 = vshrl.u32 %v434_v52, 7 }
  0x1d   :  { %1520 = vmatprep.subr.bf16.mxu1 %v1634_v25  ;;  %v1392_v38 = vcombine.low %v1934_v36, %v1859_v17  ;;  %v1393_v40 = vcombine.low %v1864_v18, %v1948_v39  ;;  %v1955_v41 = vld [vmem:[%s2234_s1 + $0x30] sm:$0xff]   ;;  %v1961_v42 = vld [vmem:[%s2234_s1 + $0x38] sm:$0xf]  ;;  %v1966_v43 = vld [vmem:[%s2234_s1 + $0x44] sm:$0xf]  ;;  %vm685_vm2 = vcmask 130112   ;;  %v1416_v14 = vcombine.low %v1934_v36, %v1934_v36 }
  0x1e   :  { %1501 = vmatpush3.bf16.msra.mxu0 %v1633_v28  ;;  %v1395_v44 = vcombine.low %v1961_v42, %v1877_v22  ;;  %v1396_v45 = vcombine.low %v1882_v23, %v1966_v43  ;;  %v1975_v46 = vld [vmem:[%s2234_s1 + $0x50] sm:$0xf]  ;;  %v1982_v48 = vld [vmem:[%s2234_s1 + $0x5c] sm:$0xf]  ;;  %v1757_v50 = vmov 1966171168   ;;  %v1419_v36 = vcombine.low %v1948_v39, %v1948_v39 }
  0x1f   :  { %1546 = vmatprep.subr.bf16.mxu0 %v1755_v1  ;;  %v1398_v47 = vcombine.low %v1975_v46, %v1893_v26  ;;  %v1399_v49 = vcombine.low %v1898_v27, %v1982_v48  ;;  %v432_v51 = vunpack.c.l.s4 %v1757_v50  ;;  %v1996_v60 = vsub.s32 0, %v1989_v54  ;;  %s1761_s22 = smov [#allocation8]  }
  0x20   :  { %1521 = vmatpush3.bf16.msra.mxu1 %v1634_v25  ;;  %vm692_vm3 = vcmask 195712   ;;  %vm792_vm4 = vcmask 1041409   ;;  %vm794_vm5 = vcmask 1042434   ;;  %vm796_vm6 = vcmask 1043459   ;;  %s1368_s3 = sshll.u32 %s1761_s22, 4  ;;  %s1369_s3 = int_to_ptr.vmem [resolvable:$true] %s1368_s3 }
  0x21   :  { %1503 = vmatmul.mubr.bf16.vlgmr.msra.gmra.mrb[0].mxu0 %v29_v32  ;;  %1594 = vmatprep.subr.bf16.mxu1 %v1755_v1  ;;  %v433_v53 = vunpack.c.0.s8 %v432_v51  ;;  %vm798_vm7 = vcmask 1044484   ;;  %vm800_vm8 = vcmask 1045509   ;;  %vm802_vm9 = vcmask 1046534  }
  0x22   :  { %1547 = vmatpush3.bf16.msra.mxu0 %v1635_v13  ;;  %1550 = vmatprep.mubr.msk.bf16.mxu0 %vm1756_vm0, %v1755_v1  ;;  %vm804_vm10 = vcmask 1047559   ;;  %vm808_vm12 = vcmask 195584   ;;  %vm877_vm13 = vcmask 1043456   ;;  %v1422_v39 = vcombine.low %v1961_v42, %v1961_v42 }
  0x23   :  { %1523 = vmatmul.mubr.bf16.vlgmr.msra.gmra.mrb[0].mxu1 %v1389_v33  ;;  %1548 = vmatprep.subr.bf16.mxu0 %v1755_v1  ;;  %v1992_v55 = vsub.s32 %v433_v53, %v1989_v54  ;;  %v2008_v53 = vld [vmem:[%s2237_s4] ss:$0 sm:$0xff]  ;;  %v985_v15 = vsel %vm877_vm13, %v1416_v14, 0  ;;  %v1425_v42 = vcombine.low %v1966_v43, %v1966_v43  ;;  %v1431_v43 = vcombine.low %v1982_v48, %v1982_v48  ;;  %v826_v48 = vld [vmem:[#allocation4] sm:$0xff]  ;;  %s1760_s4 = smov [#allocation6]  }
  0x24   :  { %1526 = vmatprep.mubr.bf16.mxu1 %v1390_v34  ;;  %1595 = vmatpush3.bf16.msra.mxu1 %v1647_v35  ;;  %v1091_v17 = vsel %vm877_vm13, %v1422_v39, 0  ;;  %s1358_s21 = sshll.u32 %s1760_s4, 4  ;;  %s1359_s21 = int_to_ptr.vmem [resolvable:$true] %s1358_s21 }
  0x25   :  { %1596 = vmatprep.subr.bf16.mxu1 %v1755_v1  ;;  %v1251_v22 = vsel %vm877_vm13, %v1431_v43, 0  ;;  %s1707_s23 = scalar_lea.vmem %s1359_s21, 128  ;;  %p1712_p1 = scmp.lt.s32.totalorder %s1359_s21, %s1359_s21 }
  0x26   :  { %p1708_p0 = scmp.ne.s32.totalorder %s1359_s21, %s1707_s23  ;;  %p1713_p2 = scmp.lt.s32.totalorder %s1707_s23, %s1707_s23 }
  0x28   :  { %p1714_p3 = por %p1713_p2, %p1712_p1 }
  0x2a   :  { %p1715_p4 = pnand %p1714_p3, %p1708_p0 }
  0x2b   :  { %1527 = vmatmul.mubr.bf16.gmra.mrb[4].mxu1 %v1940_v37 }
  0x2c   :  { %1530 = vmatprep.mubr.bf16.mxu1 %v1392_v38 }
  0x33   :  { %1531 = vmatmul.mubr.bf16.gmra.mrb[8].mxu1 %v1393_v40 }
  0x34   :  { %1534 = vmatprep.mubr.bf16.mxu1 %v1955_v41 }
  0x3b   :  { %1535 = vmatmul.mubr.bf16.gmra.mrb[12].mxu1 %v1395_v44 }
  0x3c   :  { %1538 = vmatprep.mubr.bf16.mxu1 %v1396_v45 }
  0x43   :  { %1539 = vmatmul.mubr.bf16.gmra.mrb[16].mxu1 %v1647_v35 }
  0x44   :  { %1542 = vmatprep.mubr.bf16.mxu1 %v1398_v47 }
  0x4b   :  { %1543 = vmatmul.mubr.bf16.gmra.mrb[20].mxu1 %v1399_v49 }
  0x4c   :  { %1598 = vmatprep.mubr.msk.bf16.mxu1 %vm1756_vm0, %v1755_v1 }
  0xf4   :  { %v128_v56 = vpop.f32.mrb[0].mxu0 }
  0xf5   :  { %v437_v57 = vrot.slane %v128_v56, %v1992_v55  ;;  %v1504_v58 = vpop.f32.mrb[1].mxu0  ;;  %v430_v21 = vcombine.high %v128_v56, %v128_v56 }
  0xf6   :  { %v1524_v59 = vpop.f32.mrb[0].mxu1  ;;  %v131_v61 = vpop.f32.mrb[2].mxu0 }
  0xf7   :  { %v445_v62 = vcombine.high %v437_v57, %v437_v57  ;;  %v453_v63 = vrot.slane %v437_v57, %v1992_v55  ;;  %v333_v0 = vpop.f32.mrb[1].mxu1  ;;  %v1505_v2 = vpop.f32.mrb[3].mxu0  ;;  %v444_v44 = vrot.slane %v430_v21, %v1992_v55 }
  0xf8   :  { %v1525_v3 = vpop.f32.mrb[2].mxu1 }
  0xf9   :  { %v467_v4 = vrot.slane %v445_v62, %v1992_v55  ;;  %v475_v5 = vcombine.high %v453_v63, %v453_v63  ;;  %v336_v6 = vpop.f32.mrb[3].mxu1  ;;  %v482_v7 = vrot.slane %v453_v63, %v1996_v60  ;;  %v446_v49 = vcombine.high %v444_v44, %v444_v44 }
  0xfb   :  { %v486_v8 = vrot.slane %v467_v4, %v1996_v60  ;;  %v490_v9 = vrot.slane %v475_v5, %v1996_v60  ;;  %v521_v10 = vadd.f32 %v1524_v59, %v482_v7  ;;  %v519_v11 = vadd.f32 %v482_v7, %v333_v0 }
  0xfc   :  { %v520_v12 = vadd.f32 %v482_v7, %v336_v6  ;;  %v477_v38 = vcombine.high %v467_v4, %v467_v4  ;;  %v460_v59 = vrot.slane %v444_v44, %v1992_v55  ;;  %v474_v5 = vrot.slane %v446_v49, %v1992_v55 }
  0xfd   :  { %v522_v13 = vadd.f32 %v1525_v3, %v486_v8  ;;  %1651 = vtanh.f32 %v519_v11 }
  0xfe   :  { %v1528_v19 = vpop.f32.mrb[4].mxu1  ;;  %v494_v45 = vrot.slane %v477_v38, %v1996_v60  ;;  %v498_v7 = vrot.slane %v460_v59, %v1996_v60 }
  0xff   :  { %v525_v25 = vadd.f32 %v1528_v19, %v490_v9  ;;  %v349_v28 = vpop.f32.mrb[5].mxu1  ;;  %1653 = vtanh.f32 %v522_v13  ;;  %v502_v13 = vrot.slane %v474_v5, %v1996_v60 }
 0x100   :  { %v523_v32 = vadd.f32 %v486_v8, %v349_v28  ;;  %v1529_v33 = vpop.f32.mrb[6].mxu1  ;;  %1655 = vtanh.f32 %v520_v12 }
 0x101   :  { %v526_v34 = vadd.f32 %v1529_v33, %v490_v9  ;;  %v352_v35 = vpop.f32.mrb[7].mxu1 }
 0x102   :  { %v524_v40 = vadd.f32 %v486_v8, %v352_v35  ;;  %1657 = vtanh.f32 %v523_v32 }
 0x103   :  { %1659 = vtanh.f32 %v521_v10 }
 0x104   :  { %1661 = vtanh.f32 %v526_v34  ;;  %v476_v34 = vcombine.high %v460_v59, %v460_v59 }
 0x105   :  { %1663 = vtanh.f32 %v525_v25 }
 0x106   :  { %v1532_v47 = vpop.f32.mrb[8].mxu1  ;;  %1665 = vtanh.f32 %v524_v40 }
 0x107   :  { %v529_v50 = vadd.f32 %v1532_v47, %v494_v45  ;;  %v365_v51 = vpop.f32.mrb[9].mxu1  ;;  %v1652_v58 = vpop.eup %1651  ;;  %v506_v47 = vrot.slane %v476_v34, %v1996_v60 }
 0x108   :  { %v527_v56 = vadd.f32 %v490_v9, %v365_v51  ;;  %v1533_v57 = vpop.f32.mrb[10].mxu1  ;;  %v574_v2 = vmul.f32 %v1652_v58, %v2008_v53 }
 0x109   :  { %v530_v61 = vadd.f32 %v1533_v57, %v494_v45  ;;  %v368_v62 = vpop.f32.mrb[11].mxu1  ;;  %v1654_v63 = vpop.eup %1653  ;;  %1667 = vtanh.f32 %v529_v50 }
 0x10a   :  { %v528_v0 = vadd.f32 %v494_v45, %v368_v62  ;;  %v1656_v3 = vpop.eup %1655  ;;  %v577_v4 = vmul.f32 %v1654_v63, %v2008_v53  ;;  %598 = vadd.xlane.f32.xlu0 %v574_v2  ;;  %v478_v2 = vcombine.high %v474_v5, %v474_v5 }
 0x10b   :  { %1669 = vtanh.f32 %v530_v61  ;;  %v575_v9 = vmul.f32 %v1656_v3, %v2008_v53 }
 0x10c   :  { %v1658_v6 = vpop.eup %1657  ;;  %604 = vadd.xlane.f32.xlu1 %v577_v4  ;;  %1671 = vtanh.f32 %v527_v56 }
 0x10d   :  { %v1660_v10 = vpop.eup %1659  ;;  %v578_v19 = vmul.f32 %v1658_v6, %v2008_v53  ;;  %1673 = vtanh.f32 %v528_v0 }
 0x10e   :  { %v1536_v8 = vpop.f32.mrb[12].mxu1  ;;  %v1662_v21 = vpop.eup %1661  ;;  %600 = vadd.xlane.f32.xlu0 %v575_v9  ;;  %v576_v38 = vmul.f32 %v1660_v10, %v2008_v53  ;;  %v510_v9 = vrot.slane %v478_v2, %v1996_v60 }
 0x10f   :  { %v533_v11 = vadd.f32 %v1536_v8, %v498_v7  ;;  %v381_v12 = vpop.f32.mrb[13].mxu1  ;;  %v1664_v40 = vpop.eup %1663  ;;  %v581_v44 = vmul.f32 %v1662_v21, %v2008_v53 }
 0x110   :  { %v531_v25 = vadd.f32 %v498_v7, %v381_v12  ;;  %v1537_v28 = vpop.f32.mrb[14].mxu1  ;;  %606 = vadd.xlane.f32.xlu1 %v578_v19  ;;  %v1666_v45 = vpop.eup %1665  ;;  %v580_v50 = vmul.f32 %v1664_v40, %v2008_v53 }
 0x111   :  { %v534_v32 = vadd.f32 %v1537_v28, %v502_v13  ;;  %v384_v33 = vpop.f32.mrb[15].mxu1  ;;  %1675 = vtanh.f32 %v533_v11  ;;  %v579_v58 = vmul.f32 %v1666_v45, %v2008_v53 }
 0x112   :  { %v532_v35 = vadd.f32 %v498_v7, %v384_v33  ;;  %602 = vadd.xlane.f32.xlu0 %v576_v38 }
 0x113   :  { %1677 = vtanh.f32 %v534_v32  ;;  %v1668_v51 = vpop.eup %1667 }
 0x114   :  { %612 = vadd.xlane.f32.xlu1 %v581_v44  ;;  %1679 = vtanh.f32 %v531_v25  ;;  %v584_v4 = vmul.f32 %v1668_v51, %v2008_v53 }
 0x115   :  { %v1670_v59 = vpop.eup %1669  ;;  %1681 = vtanh.f32 %v532_v35 }
 0x116   :  { %v1540_v49 = vpop.f32.mrb[16].mxu1  ;;  %610 = vadd.xlane.f32.xlu0 %v580_v50  ;;  %v1672_v6 = vpop.eup %1671  ;;  %v585_v7 = vmul.f32 %v1670_v59, %v2008_v53 }
 0x117   :  { %v537_v56 = vadd.f32 %v1540_v49, %v506_v47  ;;  %v397_v57 = vpop.f32.mrb[17].mxu1  ;;  %v1674_v8 = vpop.eup %1673  ;;  %v582_v11 = vmul.f32 %v1672_v6, %v2008_v53 }
 0x118   :  { %v535_v61 = vadd.f32 %v502_v13, %v397_v57  ;;  %v1541_v62 = vpop.f32.mrb[18].mxu1  ;;  %608 = vadd.xlane.f32.xlu1 %v579_v58 }
 0x119   :  { %v538_v63 = vadd.f32 %v1541_v62, %v506_v47  ;;  %v400_v0 = vpop.f32.mrb[19].mxu1  ;;  %1683 = vtanh.f32 %v537_v56 }
 0x11a   :  { %v536_v3 = vadd.f32 %v502_v13, %v400_v0  ;;  %618 = vadd.xlane.f32.xlu0 %v584_v4  ;;  %v583_v13 = vmul.f32 %v1674_v8, %v2008_v53  ;;  %v1758_v8 = vmov -inf  }
 0x11b   :  { %1685 = vtanh.f32 %v538_v63  ;;  %v1676_v12 = vpop.eup %1675  ;;  %136 = vst.msk [vmem:[#allocation3] sm:$0xff] %vm135_vm1, %v1758_v8 }
 0x11c   :  { %620 = vadd.xlane.f32.xlu1 %v585_v7  ;;  %1687 = vtanh.f32 %v535_v61  ;;  %v588_v35 = vmul.f32 %v1676_v12, %v2008_v53 }
 0x11d   :  { %v1678_v21 = vpop.eup %1677  ;;  %1689 = vtanh.f32 %v536_v3 }
 0x11e   :  { %v1544_v10 = vpop.f32.mrb[20].mxu1  ;;  %614 = vadd.xlane.f32.xlu0 %v582_v11  ;;  %v1680_v38 = vpop.eup %1679  ;;  %v589_v40 = vmul.f32 %v1678_v21, %v2008_v53 }
 0x11f   :  { %v541_v19 = vadd.f32 %v1544_v10, %v510_v9  ;;  %v413_v5 = vpop.f32.mrb[21].mxu1  ;;  %v1682_v44 = vpop.eup %1681  ;;  %v586_v45 = vmul.f32 %v1680_v38, %v2008_v53 }
 0x120   :  { %v539_v25 = vadd.f32 %v506_v47, %v413_v5  ;;  %v1545_v28 = vpop.f32.mrb[22].mxu1  ;;  %616 = vadd.xlane.f32.xlu1 %v583_v13  ;;  %v587_v49 = vmul.f32 %v1682_v44, %v2008_v53 }
 0x121   :  { %v542_v32 = vadd.f32 %v1545_v28, %v510_v9  ;;  %v416_v33 = vpop.f32.mrb[23].mxu1 }
 0x122   :  { %v540_v34 = vadd.f32 %v510_v9, %v416_v33  ;;  %626 = vadd.xlane.f32.xlu0 %v588_v35  ;;  %1691 = vtanh.f32 %v539_v25  ;;  %v2044_v33 = vand.u32 127, %v434_v52 }
 0x123   :  { %v1684_v47 = vpop.eup %1683 }
 0x124   :  { %628 = vadd.xlane.f32.xlu1 %v589_v40  ;;  %1693 = vtanh.f32 %v540_v34  ;;  %v592_v51 = vmul.f32 %v1684_v47, %v2008_v53  ;;  %v680_v38 = vadd.s32 4294967288, %v2044_v33  ;;  %v687_v40 = vadd.s32 4294967280, %v2044_v33 }
 0x125   :  { %v1686_v50 = vpop.eup %1685  ;;  %1695 = vtanh.f32 %v541_v19  ;;  %vm651_vm11 = vcmp.lt.s32.totalorder %v2044_v33, 20 }
 0x126   :  { %622 = vadd.xlane.f32.xlu0 %v586_v45  ;;  %1697 = vtanh.f32 %v542_v32  ;;  %v1688_v56 = vpop.eup %1687  ;;  %v593_v57 = vmul.f32 %v1686_v50, %v2008_v53  ;;  %v2049_v47 = vsub.s32 %v680_v38, %v1989_v54  ;;  %v2057_v52 = vsub.s32 %v687_v40, %v1989_v54 }
 0x127   :  { %v1690_v58 = vpop.eup %1689  ;;  %v590_v59 = vmul.f32 %v1688_v56, %v2008_v53 }
 0x128   :  { %624 = vadd.xlane.f32.xlu1 %v587_v49  ;;  %v591_v62 = vmul.f32 %v1690_v58, %v2008_v53  ;;  %v2053_v49 = vsub.s32 %v2044_v33, %v1989_v54 }
 0x12a   :  { %634 = vadd.xlane.f32.xlu0 %v592_v51 }
 0x12c   :  { %636 = vadd.xlane.f32.xlu1 %v593_v57  ;;  %v1692_v61 = vpop.eup %1691 }
 0x12d   :  { %v594_v0 = vmul.f32 %v1692_v61, %v2008_v53 }
 0x12e   :  { %v1694_v63 = vpop.eup %1693  ;;  %630 = vadd.xlane.f32.xlu0 %v590_v59 }
 0x12f   :  { %v1696_v2 = vpop.eup %1695  ;;  %v595_v3 = vmul.f32 %v1694_v63, %v2008_v53 }
 0x130   :  { %632 = vadd.xlane.f32.xlu1 %v591_v62  ;;  %v1698_v4 = vpop.eup %1697  ;;  %v596_v6 = vmul.f32 %v1696_v2, %v2008_v53 }
 0x131   :  { %v597_v7 = vmul.f32 %v1698_v4, %v2008_v53 }
 0x132   :  { %638 = vadd.xlane.f32.xlu0 %v594_v0 }
 0x134   :  { %640 = vadd.xlane.f32.xlu1 %v595_v3 }
 0x136   :  { %642 = vadd.xlane.f32.xlu0 %v596_v6 }
 0x138   :  { %644 = vadd.xlane.f32.xlu1 %v597_v7 }
 0x197   :  { %v599_v9 = vpop.xlane.xlu0 %598 }
 0x198   :  { %v679_v3 = vrot.slane %v599_v9, %v2053_v49 }
 0x199   :  { %v605_v10 = vpop.xlane.xlu1 %604 }
 0x19a   :  { %v697_v59 = vrot.slane %v605_v10, %v2053_v49 }
 0x19b   :  { %v601_v11 = vpop.xlane.xlu0 %600 }
 0x19c   :  { %v684_v63 = vrot.slane %v601_v11, %v2049_v47 }
 0x19d   :  { %v607_v12 = vpop.xlane.xlu1 %606 }
 0x19e   :  { %v701_v50 = vrot.slane %v607_v12, %v2049_v47 }
 0x19f   :  { %v603_v19 = vpop.xlane.xlu0 %602 }
 0x1a0   :  { %v702_v4 = vsel %vm685_vm2, %v701_v50, %v697_v59  ;;  %v691_v6 = vrot.slane %v603_v19, %v2057_v52 }
 0x1a1   :  { %v613_v5 = vpop.xlane.xlu1 %612 }
 0x1a2   :  { %v715_v54 = vrot.slane %v613_v5, %v2049_v47 }
 0x1a3   :  { %v611_v13 = vpop.xlane.xlu0 %610 }
 0x1a4   :  { %v711_v56 = vrot.slane %v611_v13, %v2053_v49 }
 0x1a5   :  { %v609_v21 = vpop.xlane.xlu1 %608 }
 0x1a6   :  { %v706_v61 = vrot.slane %v609_v21, %v2057_v52  ;;  %v716_v10 = vsel %vm685_vm2, %v715_v54, %v711_v56 }
 0x1a7   :  { %v619_v25 = vpop.xlane.xlu0 %618 }
 0x1a8   :  { %v729_v0 = vrot.slane %v619_v25, %v2049_v47  ;;  %v707_v21 = vsel %vm692_vm3, %v706_v61, %v702_v4 }
 0x1a9   :  { %v621_v28 = vpop.xlane.xlu1 %620 }
 0x1aa   :  { %v734_v9 = vrot.slane %v621_v28, %v2057_v52 }
 0x1ab   :  { %v615_v53 = vpop.xlane.xlu0 %614 }
 0x1ac   :  { %v720_v2 = vrot.slane %v615_v53, %v2057_v52  ;;  %v686_v53 = vsel %vm685_vm2, %v684_v63, %v679_v3 }
 0x1ad   :  { %v617_v32 = vpop.xlane.xlu1 %616 }
 0x1ae   :  { %v725_v57 = vrot.slane %v617_v32, %v2053_v49  ;;  %v721_v32 = vsel %vm692_vm3, %v720_v2, %v716_v10 }
 0x1af   :  { %v627_v34 = vpop.xlane.xlu0 %626 }
 0x1b0   :  { %v730_v12 = vsel %vm685_vm2, %v729_v0, %v725_v57  ;;  %v748_v38 = vrot.slane %v627_v34, %v2057_v52 }
 0x1b1   :  { %v629_v35 = vpop.xlane.xlu1 %628 }
 0x1b2   :  { %v753_v11 = vrot.slane %v629_v35, %v2053_v49  ;;  %v693_v35 = vsel %vm692_vm3, %v691_v6, %v686_v53 }
 0x1b3   :  { %v623_v44 = vpop.xlane.xlu0 %622  ;;  %v793_v50 = vsel %vm792_vm4, %v707_v21, %v693_v35 }
 0x1b4   :  { %v739_v7 = vrot.slane %v623_v44, %v2053_v49  ;;  %v735_v44 = vsel %vm692_vm3, %v734_v9, %v730_v12  ;;  %v795_v34 = vsel %vm794_vm5, %v721_v32, %v793_v50  ;;  %v1428_v32 = vcombine.low %v1975_v46, %v1975_v46 }
 0x1b5   :  { %v625_v45 = vpop.xlane.xlu1 %624  ;;  %v797_v63 = vsel %vm796_vm6, %v735_v44, %v795_v34 }
 0x1b6   :  { %v743_v62 = vrot.slane %v625_v45, %v2049_v47 }
 0x1b7   :  { %v635_v51 = vpop.xlane.xlu0 %634 }
 0x1b8   :  { %v744_v25 = vsel %vm685_vm2, %v743_v62, %v739_v7  ;;  %v767_v61 = vrot.slane %v635_v51, %v2053_v49 }
 0x1b9   :  { %v637_v58 = vpop.xlane.xlu1 %636  ;;  %v749_v56 = vsel %vm692_vm3, %v748_v38, %v744_v25  ;;  %v1197_v38 = vsel %vm877_vm13, %v1428_v32, 0 }
 0x1ba   :  { %v771_v45 = vrot.slane %v637_v58, %v2049_v47  ;;  %v799_v54 = vsel %vm798_vm7, %v749_v56, %v797_v63  ;;  %1597 = vmatpush3.bf16.msra.mxu1 %v1197_v38 }
 0x1bb   :  { %v631_v8 = vpop.xlane.xlu0 %630 }
 0x1bc   :  { %v757_v5 = vrot.slane %v631_v8, %v2049_v47  ;;  %v772_v58 = vsel %vm685_vm2, %v771_v45, %v767_v61 }
 0x1bd   :  { %v633_v13 = vpop.xlane.xlu1 %632 }
 0x1be   :  { %v762_v19 = vrot.slane %v633_v13, %v2057_v52  ;;  %v758_v40 = vsel %vm685_vm2, %v757_v5, %v753_v11 }
 0x1bf   :  { %v639_v28 = vpop.xlane.xlu0 %638 }
 0x1c0   :  { %v776_v57 = vrot.slane %v639_v28, %v2057_v52  ;;  %v763_v62 = vsel %vm692_vm3, %v762_v19, %v758_v40  ;;  %v1410_v19 = vcombine.low %v1909_v30, %v1909_v30 }
 0x1c1   :  { %v641_v59 = vpop.xlane.xlu1 %640  ;;  %v801_v2 = vsel %vm800_vm8, %v763_v62, %v799_v54  ;;  %v1413_v62 = vcombine.low %v1914_v31, %v1914_v31 }
 0x1c2   :  { %v777_v3 = vsel %vm692_vm3, %v776_v57, %v772_v58  ;;  %v781_v4 = vrot.slane %v641_v59, %v2053_v49  ;;  %v879_v53 = vsel %vm877_vm13, %v1410_v19, 0 }
 0x1c3   :  { %v643_v0 = vpop.xlane.xlu0 %642  ;;  %v803_v12 = vsel %vm802_vm9, %v777_v3, %v801_v2  ;;  %1549 = vmatpush3.bf16.msra.mxu0 %v879_v53  ;;  %v933_v54 = vsel %vm877_vm13, %v1413_v62, 0 }
 0x1c4   :  { %v785_v6 = vrot.slane %v643_v0, %v2049_v47  ;;  %v1759_v47 = vmov 0   ;;  %1554 = vmatprep.subr.bf16.mxu0 %v1755_v1 }
 0x1c5   :  { %v645_v51 = vpop.xlane.xlu1 %644  ;;  %1617 = vset.pattern.permute.xlu1 %v1759_v47  ;;  %1618 = vset.pattern.permute.xlu0 %v1759_v47 }
 0x1c6   :  { %v790_v7 = vrot.slane %v645_v51, %v2057_v52  ;;  %v786_v8 = vsel %vm685_vm2, %v785_v6, %v781_v4  ;;  %v810_v52 = vld [vmem:[#allocation3] sm:$0xff] }
 0x1c8   :  { %v791_v10 = vsel %vm692_vm3, %v790_v7, %v786_v8 }
 0x1c9   :  { %v805_v11 = vsel %vm804_vm10, %v791_v10, %v803_v12 }
 0x1ca   :  { %v807_v5 = vsel %vm651_vm11, %v805_v11, -1e+30 }
 0x1cb   :  { %v811_v49 = vsel %vm808_vm12, %v807_v5, -inf  ;;  %809 = vst.msk [vmem:[#allocation8] sm:$0xff] %vm808_vm12, %v807_v5 }
 0x1cc   :  { %812 = vmax.xlane.f32.xlu0 %v811_v49 }
 0x259   :  { %v813_v13 = vpop.xlane.xlu0 %812 }
 0x25a   :  { %v814_v21 = vmax.f32 %v810_v52, %v813_v13 }
 0x25c   :  { %v815_v33 = vsub.f32 %v810_v52, %v814_v21  ;;  %1325 = vst.msk [vmem:[#allocation3] sm:$0xff] %vm135_vm1, %v814_v21  ;;  %820 = vperm.xlu1 %1617, %v814_v21  }
 0x25e   :  { %v816_v9 = vmul.f32 1.442695, %v815_v33 }
 0x260   :  { %1699 = vpow2.f32 %v816_v9 }
 0x263   :  { %v1341_v2 = vld [vmem:[#allocation3] sm:$0xff] }
 0x26a   :  { %v2109_v25 = vpop.eup %1699 }
 0x26b   :  { %1296 = vperm.xlu1 %1617, %v2109_v25  }
 0x2db   :  { %v821_v40 = vpop.permute.xlu1 %820 }
 0x2dc   :  { %v823_v35 = vsub.f32 %v807_v5, %v821_v40  ;;  %v827_v5 = vmul.f32 %v2109_v25, %v826_v48 }
 0x2de   :  { %v824_v44 = vmul.f32 1.442695, %v823_v35 }
 0x2e0   :  { %1701 = vpow2.f32 %v824_v44 }
 0x2ea   :  { %v1702_v45 = vpop.eup %1701 }
 0x2eb   :  { %v834_v28 = vpack.c.bf16 %v1702_v45, %v1702_v45  ;;  %v828_v30 = vsel %vm808_vm12, %v1702_v45, 0.0 }
 0x2ec   :  { %829 = vadd.xlane.f32.xlu0 %v828_v30 }
 0x2ed   :  { %v842_v50 = vrot.slane %v834_v28, %v1992_v55 }
 0x2ef   :  { %v843_v56 = vcombine.high %v842_v50, %v842_v50  ;;  %v850_v57 = vrot.slane %v842_v50, %v1992_v55 }
 0x2f1   :  { %v857_v59 = vrot.slane %v843_v56, %v1992_v55  ;;  %v1409_v46 = vpack.i.b16 %v850_v57, %v850_v57  ;;  %v861_v63 = vunpack.i.h.s16 %v850_v57  ;;  %v858_v7 = vcombine.high %v850_v57, %v850_v57 }
 0x2f3   :  { %v872_v34 = vrot.slane %v1409_v46, %v1996_v60  ;;  %v2124_v61 = vcombine.high %v857_v59, %v857_v59  ;;  %v921_v31 = vpack.i.b16 %v861_v63, %v861_v63  ;;  %v863_v4 = vunpack.i.h.s16 %v857_v59 }
 0x2f4   :  { %v1421_v18 = vpack.i.b16 %v858_v7, %v858_v7  ;;  %v865_v8 = vunpack.i.h.s16 %v858_v7 }
 0x2f5   :  { %1551 = vmatmul.mubr.msk.bf16.vlgmr.msra.gmra.mrb[4].mxu0 %vm808_vm12, %v872_v34  ;;  %v1427_v58 = vpack.i.b16 %v2124_v61, %v2124_v61  ;;  %v925_v0 = vrot.slane %v921_v31, %v1996_v60  ;;  %v1027_v6 = vpack.i.b16 %v863_v4, %v863_v4  ;;  %v867_v11 = vunpack.i.h.s16 %v2124_v61 }
 0x2f6   :  { %1555 = vmatpush3.bf16.msra.mxu0 %v1412_v16  ;;  %1558 = vmatprep.mubr.msk.bf16.mxu0 %vm1756_vm0, %v1755_v1  ;;  %v1415_v16 = vpack.i.b16 %v857_v59, %v857_v59  ;;  %v1133_v10 = vpack.i.b16 %v865_v8, %v865_v8 }
 0x2f7   :  { %1556 = vmatprep.subr.bf16.mxu0 %v1755_v1  ;;  %v1191_v55 = vrot.slane %v1427_v58, %v1996_v60  ;;  %v1031_v51 = vrot.slane %v1027_v6, %v1996_v60  ;;  %v1239_v23 = vpack.i.b16 %v867_v11, %v867_v11 }
 0x2f8   :  { %v979_v3 = vrot.slane %v1415_v16, %v1996_v60  ;;  %v1137_v12 = vrot.slane %v1133_v10, %v1996_v60 }
 0x2f9   :  { %1599 = vmatmul.mubr.msk.bf16.vlgmr.msra.gmra.mrb[24].mxu1 %vm808_vm12, %v1191_v55 }
 0x2fa   :  { %1557 = vmatpush3.bf16.msra.mxu0 %v933_v54 }
 0x2fb   :  { %1562 = vmatprep.subr.bf16.mxu0 %v1755_v1 }
 0x2fd   :  { %1559 = vmatmul.mubr.msk.bf16.vlgmr.msra.gmra.mrb[8].mxu0 %vm808_vm12, %v925_v0 }
 0x2fe   :  { %1563 = vmatpush3.bf16.msra.mxu0 %v1940_v37  ;;  %1566 = vmatprep.mubr.msk.bf16.mxu0 %vm1756_vm0, %v1755_v1  ;;  %v1039_v37 = vsel %vm877_vm13, %v1419_v36, 0 }
 0x2ff   :  { %1564 = vmatprep.subr.bf16.mxu0 %v1755_v1 }
 0x302   :  { %1565 = vmatpush3.bf16.msra.mxu0 %v985_v15  ;;  %1344 = vperm.xlu0 %1618, %v1341_v2  }
 0x303   :  { %1570 = vmatprep.subr.bf16.mxu0 %v1755_v1 }
 0x305   :  { %1567 = vmatmul.mubr.msk.bf16.vlgmr.msra.gmra.mrb[12].mxu0 %vm808_vm12, %v979_v3 }
 0x306   :  { %1571 = vmatpush3.bf16.msra.mxu0 %v1418_v20  ;;  %1574 = vmatprep.mubr.msk.bf16.mxu0 %vm1756_vm0, %v1755_v1  ;;  %v1085_v20 = vrot.slane %v1421_v18, %v1996_v60 }
 0x307   :  { %1572 = vmatprep.subr.bf16.mxu0 %v1755_v1 }
 0x30a   :  { %1573 = vmatpush3.bf16.msra.mxu0 %v1039_v37 }
 0x30b   :  { %1578 = vmatprep.subr.bf16.mxu0 %v1755_v1 }
 0x30d   :  { %1575 = vmatmul.mubr.msk.bf16.vlgmr.msra.gmra.mrb[16].mxu0 %vm808_vm12, %v1031_v51 }
 0x30e   :  { %1579 = vmatpush3.bf16.msra.mxu0 %v1955_v41  ;;  %1582 = vmatprep.mubr.msk.bf16.mxu0 %vm1756_vm0, %v1755_v1  ;;  %v1145_v41 = vsel %vm877_vm13, %v1425_v42, 0 }
 0x30f   :  { %1580 = vmatprep.subr.bf16.mxu0 %v1755_v1 }
 0x312   :  { %1581 = vmatpush3.bf16.msra.mxu0 %v1091_v17  ;;  %v1340_v17 = vld [vmem:[#allocation8] sm:$0xff] }
 0x313   :  { %1586 = vmatprep.subr.bf16.mxu0 %v1755_v1 }
 0x315   :  { %1583 = vmatmul.mubr.msk.bf16.vlgmr.msra.gmra.mrb[20].mxu0 %vm808_vm12, %v1085_v20 }
 0x316   :  { %1587 = vmatpush3.bf16.msra.mxu0 %v1424_v24  ;;  %1590 = vmatprep.mubr.msk.bf16.mxu0 %vm1756_vm0, %v1755_v1  ;;  %v1243_v24 = vrot.slane %v1239_v23, %v1996_v60 }
 0x317   :  { %1588 = vmatprep.subr.bf16.mxu0 %v1755_v1 }
 0x31a   :  { %1589 = vmatpush3.bf16.msra.mxu0 %v1145_v41  ;;  %v1297_v41 = vpop.permute.xlu1 %1296 }
 0x31b   :  { %1602 = vmatprep.subr.bf16.mxu0 %v1755_v1  ;;  %v1299_v10 = vmul.f32 0.0, %v1297_v41 }
 0x31d   :  { %1591 = vmatmul.mubr.msk.bf16.vlgmr.msra.gmra.mrb[24].mxu0 %vm808_vm12, %v1137_v12 }
 0x31e   :  { %1603 = vmatpush3.bf16.msra.mxu0 %v1430_v29  ;;  %1606 = vmatprep.mubr.msk.bf16.mxu0 %vm1756_vm0, %v1755_v1 }
 0x31f   :  { %1604 = vmatprep.subr.bf16.mxu0 %v1755_v1 }
 0x322   :  { %1605 = vmatpush3.bf16.msra.mxu0 %v1251_v22 }
 0x325   :  { %1607 = vmatmul.mubr.msk.bf16.vlgmr.msra.gmra.mrb[28].mxu0 %vm808_vm12, %v1243_v24 }
 0x379   :  { %v830_v49 = vpop.xlane.xlu0 %829 }
 0x37a   :  { %v831_v47 = vadd.f32 %v830_v49, %v827_v5 }
 0x37c   :  { %833 = vst.msk [vmem:[#allocation4] sm:$0xff] %vm135_vm1, %v831_v47 }
 0x381   :  { %v1345_v6 = vpop.permute.xlu0 %1344 }
 0x382   :  { %v1347_v42 = vsub.f32 %v1340_v17, %v1345_v6 }
 0x383   :  { %v1329_v26 = vld [vmem:[#allocation4] sm:$0xff] }
 0x384   :  { %1703 = vrcp.f32 %v1329_v26  ;;  %v1348_v8 = vmul.f32 1.442695, %v1347_v42 }
 0x386   :  { %1705 = vpow2.f32 %v1348_v8 }
 0x38e   :  { %v1704_v27 = vpop.eup %1703 }
 0x38f   :  { %1335 = vperm.xlu1 %1617, %v1704_v27  }
 0x390   :  { %v1706_v43 = vpop.eup %1705 }
 0x3c8   :  { %v915_v1 = vpop.f32.mrb[4].mxu0 }
 0x3c9   :  { %v1552_v29 = vpop.f32.mrb[5].mxu0 }
 0x3ca   :  { %v918_v52 = vpop.f32.mrb[6].mxu0 }
 0x3cb   :  { %v1553_v13 = vpop.f32.mrb[7].mxu0 }
 0x3cc   :  { %v1233_v21 = vpop.f32.mrb[24].mxu1 }
 0x3cd   :  { %v1600_v33 = vpop.f32.mrb[25].mxu1  ;;  %v1318_v16 = vrot.slane %v1233_v21, 2 }
 0x3ce   :  { %v1236_v60 = vpop.f32.mrb[26].mxu1 }
 0x3cf   :  { %v1601_v9 = vpop.f32.mrb[27].mxu1 }
 0x3d0   :  { %v969_v19 = vpop.f32.mrb[8].mxu0 }
 0x3d1   :  { %v1308_v53 = vrot.slane %v969_v19, 7  ;;  %v1560_v32 = vpop.f32.mrb[9].mxu0 }
 0x3d2   :  { %v972_v25 = vpop.f32.mrb[10].mxu0 }
 0x3d3   :  { %v1309_v38 = vsel %vm792_vm4, %v1308_v53, %v915_v1  ;;  %v1561_v40 = vpop.f32.mrb[11].mxu0 }
 0x3d8   :  { %v1021_v35 = vpop.f32.mrb[12].mxu0 }
 0x3d9   :  { %v1310_v44 = vrot.slane %v1021_v35, 6  ;;  %v1568_v45 = vpop.f32.mrb[13].mxu0 }
 0x3da   :  { %v1024_v28 = vpop.f32.mrb[14].mxu0 }
 0x3db   :  { %v1311_v30 = vsel %vm794_vm5, %v1310_v44, %v1309_v38  ;;  %v1569_v50 = vpop.f32.mrb[15].mxu0 }
 0x3e0   :  { %v1075_v56 = vpop.f32.mrb[16].mxu0 }
 0x3e1   :  { %v1312_v57 = vrot.slane %v1075_v56, 5  ;;  %v1576_v59 = vpop.f32.mrb[17].mxu0 }
 0x3e2   :  { %v1078_v46 = vpop.f32.mrb[18].mxu0 }
 0x3e3   :  { %v1313_v34 = vsel %vm796_vm6, %v1312_v57, %v1311_v30  ;;  %v1577_v61 = vpop.f32.mrb[19].mxu0 }
 0x3e8   :  { %v1127_v62 = vpop.f32.mrb[20].mxu0 }
 0x3e9   :  { %v1314_v63 = vrot.slane %v1127_v62, 4  ;;  %v1584_v58 = vpop.f32.mrb[21].mxu0 }
 0x3ea   :  { %v1130_v55 = vpop.f32.mrb[22].mxu0 }
 0x3eb   :  { %v1315_v54 = vsel %vm798_vm7, %v1314_v63, %v1313_v34  ;;  %v1585_v31 = vpop.f32.mrb[23].mxu0 }
 0x3f0   :  { %v1181_v0 = vpop.f32.mrb[24].mxu0 }
 0x3f1   :  { %v1316_v14 = vrot.slane %v1181_v0, 3  ;;  %v1592_v15 = vpop.f32.mrb[25].mxu0 }
 0x3f2   :  { %v1184_v2 = vpop.f32.mrb[26].mxu0 }
 0x3f3   :  { %v1317_v3 = vsel %vm800_vm8, %v1316_v14, %v1315_v54  ;;  %v1593_v36 = vpop.f32.mrb[27].mxu0 }
 0x3f4   :  { %v1319_v4 = vsel %vm802_vm9, %v1318_v16, %v1317_v3 }
 0x3f8   :  { %v1287_v37 = vpop.f32.mrb[28].mxu0 }
 0x3f9   :  { %v1320_v51 = vrot.slane %v1287_v37, 1  ;;  %v1608_v39 = vpop.f32.mrb[29].mxu0 }
 0x3fa   :  { %v1290_v7 = vpop.f32.mrb[30].mxu0 }
 0x3fb   :  { %v1609_v18 = vpop.f32.mrb[31].mxu0  ;;  %v1321_v20 = vsel %vm804_vm10, %v1320_v51, %v1319_v4 }
 0x3fc   :  { %v1323_v12 = vadd.f32 %v1321_v20, %v1299_v10 }
 0x40e   :  { %v1336_v11 = vpop.permute.xlu1 %1335 }
 0x40f   :  { %v1338_v22 = vmul.f32 %v1336_v11, %v1323_v12  ;;  %v1350_v23 = vmul.f32 %v1706_v43, %v1336_v11 }
 0x411   :  { %1339 = vst [vmem:[#allocation6] sm:$0xff] %v1338_v22  ;;  %1351 = vst.msk [vmem:[#allocation8] sm:$0xff] %vm808_vm12, %v1350_v23 }
 0x412   :  { %1718 = shalt.err (!%p1715_p4)
}
 0x413   :  { %s1719_s26 = scalar_lea.hbm %s2238_s5, 128 }
 0x414   :  { %p1720_p5 = scmp.ne.s32.totalorder %s2238_s5, %s1719_s26  ;;  %p1723_p6 = scmp.lt.u32.totalorder %s1719_s26, %s2238_s5 }
 0x416   :  { %p1725_p7 = pnand %p1723_p6, %p1720_p5 }
 0x418   :  { %1728 = shalt.err (!%p1725_p7)
}
 0x419   :  { %1361 = dma.vmem_to_hbm [thread:$0]  %s1359_s21, 128, %s2238_s5, [#allocation7]  }
 0x41a   :  { %s1729_s7 = scalar_lea.vmem %s1369_s3, 128  ;;  %p1734_p9 = scmp.lt.s32.totalorder %s1369_s3, %s1369_s3 }
 0x41b   :  { %p1730_p8 = scmp.ne.s32.totalorder %s1369_s3, %s1729_s7  ;;  %p1735_p10 = scmp.lt.s32.totalorder %s1729_s7, %s1729_s7 }
 0x41d   :  { %p1736_p11 = por %p1735_p10, %p1734_p9 }
 0x41f   :  { %p1737_p12 = pnand %p1736_p11, %p1730_p8 }
 0x421   :  { %1740 = shalt.err (!%p1737_p12)
}
 0x422   :  { %s1741_s10 = scalar_lea.hbm %s2239_s6, 128 }
 0x423   :  { %p1742_p13 = scmp.ne.s32.totalorder %s2239_s6, %s1741_s10  ;;  %p1745_p0 = scmp.lt.u32.totalorder %s1741_s10, %s2239_s6 }
 0x425   :  { %p1747_p1 = pnand %p1745_p0, %p1742_p13 }
 0x427   :  { %1750 = shalt.err (!%p1747_p1)
}
 0x428   :  { %1371 = dma.vmem_to_hbm [thread:$0]  %s1369_s3, 128, %s2239_s6, [#allocation9]  }
 0x429   :  { %1751 = dma.done.wait [#allocation7], 128  }
 0x42a   :  { %1752 = vsyncadd [#allocation7], 4294967168 }
 0x42b   :  { %1753 = dma.done.wait [#allocation9], 128  }
 0x42c   :  { %1754 = vsyncadd [#allocation9], 4294967168 }
 0x42d   :  { %1378 = vsyncpa [#allocation7], 1 }
 0x42e   :  { %1379 = vsyncpa [#allocation9], 1 }

</bundles_post_ra>
